<compile_context>
chip_gen: v6e
topology: v6e:2x2x1
jax: 0.10.0
libtpu: 0.0.40
codegen_flags: <defaults>
</compile_context>

<pallas_src>
import jax
import jax.numpy as jnp
from jax import lax
from jax.experimental import pallas as pl
from jax.experimental.pallas import tpu as pltpu


# ---------------------------------------------------------------------------
# Pallas kernel (one grid step = Bblk batch elements):
#   onehot = (iota(S) == cols)           (built in-register, bf16, exact)
#   mix    = onehot @ ctx                (per-batch, bf16 MXU, f32 acc)
#   y      = tanh(mix @ Wm + out @ Wo + b)   (flattened (Bblk*T, H) matmuls)
# ---------------------------------------------------------------------------
def _hard_attn_kernel(cols_ref, ctx_ref, out_ref, wmix_ref, wout_ref, b_ref, y_ref):
    bblk, s, h = ctx_ref.shape
    t = out_ref.shape[1]

    # Hard one-hot attention from per-row column indices (-1 -> all-zero row).
    col_ids = lax.broadcasted_iota(jnp.int32, (bblk, t, s), 2)
    onehot = (col_ids == cols_ref[...]).astype(jnp.float32).astype(jnp.bfloat16)

    # mix[b] = onehot[b] @ ctx[b]   (exact: 0/1 weights, bf16 ctx, f32 accumulation)
    mix = jnp.einsum(
        "bts,bsh->bth", onehot, ctx_ref[...], preferred_element_type=jnp.float32
    )

    # Split-weight linear over all Bblk*T rows at once (no concat).
    bt = bblk * t
    mix2 = mix.reshape(bt, h).astype(jnp.bfloat16)   # values are bf16-exact already
    out2 = out_ref[...].reshape(bt, h)               # bf16
    pre = (
        jnp.dot(mix2, wmix_ref[...], preferred_element_type=jnp.float32)
        + jnp.dot(out2, wout_ref[...], preferred_element_type=jnp.float32)
        + b_ref[...]                                 # (1, H) f32, broadcasts over rows
    )
    y_ref[...] = jnp.tanh(pre).reshape(bblk, t, h).astype(y_ref.dtype)


# ---------------------------------------------------------------------------
# JAX glue: sequential "inserted" counter -> per-row column index (and dense attn
# only because the module returns it).
# ---------------------------------------------------------------------------
def build_hard_attn(input_var, insert_tok, T, S):
    """Reproduces the Python double loop of HardAttention.forward (T != 1 branch),
    with self.inserted initialized to zeros (init_inserted).
    Returns (eff_cols (B,T) int32 with -1 = no attention, attn (B,T,S) f32)."""
    B = input_var.shape[0]
    insert_tok_arr = jnp.asarray(insert_tok, dtype=input_var.dtype)  # (K,)

    def step(inserted, i):
        tok = input_var[:, i]                                              # (B,)
        is_insert = jnp.any(tok[:, None] == insert_tok_arr[None, :], axis=1)
        cond = S >= i - inserted                                           # checked BEFORE increment
        inc = jnp.where((i > 0) & cond, is_insert.astype(jnp.int32), 0)
        inserted_new = inserted + inc
        col_raw = i - inserted_new - 1
        col = jnp.where(col_raw < 0, col_raw + S, col_raw)                 # torch negative-index wrap
        eff = jnp.where(cond, col, -1)                                     # -1 => row stays all-zero
        eff = jnp.where(i == 0, 0, eff)
        return inserted_new, eff

    inserted0 = jnp.zeros((B,), jnp.int32)
    _, eff_cols = lax.scan(step, inserted0, jnp.arange(T))                 # (T, B)
    eff_cols = eff_cols.T.astype(jnp.int32)                                # (B, T)
    attn = (eff_cols[:, :, None] == jnp.arange(S)[None, None, :]).astype(jnp.float32)
    return eff_cols, attn


def _pick_bblk(B, T, target_rows=256):
    """Largest divisor of B with Bblk*T <= target_rows that keeps >= 2 grid steps
    (so both v7x TensorCores get work)."""
    best = 1
    for cand in range(1, B + 1):
        if B % cand:
            continue
        if cand > 1 and cand * T > target_rows:
            break
        if B // cand >= 2 or B == 1:
            best = cand
    return best


# ---------------------------------------------------------------------------
# Wrapper
# ---------------------------------------------------------------------------
def hard_attention_forward(input_var, output, context, insert_tok, w, b):
    """output: (B, T, H), context: (B, S, H), input_var: (B, T) int tokens,
    w: (H, 2H) nn.Linear weight, b: (H,) bias.  Returns (y (B,T,H) f32, attn (B,T,S) f32)."""
    B, T, H = output.shape
    S = context.shape[1]

    eff_cols, attn = build_hard_attn(input_var, insert_tok, T, S)

    bblk = _pick_bblk(B, T)
    n_steps = B // bblk

    w = w.astype(jnp.float32)
    w_mix = jnp.transpose(w[:, :H]).astype(jnp.bfloat16)   # (H, H): mix @ W_mix
    w_out = jnp.transpose(w[:, H:]).astype(jnp.bfloat16)   # (H, H): out @ W_out
    bias = b.astype(jnp.float32).reshape(1, H)

    cols3 = eff_cols.reshape(B, T, 1)                      # indices ride sublanes
    ctx_bf = context.astype(jnp.bfloat16)
    out_bf = output.astype(jnp.bfloat16)

    flops = 2 * B * T * S * H + 2 * B * T * (2 * H) * H
    bytes_accessed = (
        B * T * 4 + B * S * H * 2 + B * T * H * 2 + 2 * H * H * 2 + H * 4 + B * T * H * 4
    )

    y = pl.pallas_call(
        _hard_attn_kernel,
        out_shape=jax.ShapeDtypeStruct((B, T, H), jnp.float32),
        grid=(n_steps,),
        in_specs=[
            pl.BlockSpec((bblk, T, 1), lambda i: (i, 0, 0)),   # eff column indices (int32)
            pl.BlockSpec((bblk, S, H), lambda i: (i, 0, 0)),   # context (bf16)
            pl.BlockSpec((bblk, T, H), lambda i: (i, 0, 0)),   # decoder states (bf16)
            pl.BlockSpec((H, H), lambda i: (0, 0)),            # W_mix^T (resident)
            pl.BlockSpec((H, H), lambda i: (0, 0)),            # W_out^T (resident)
            pl.BlockSpec((1, H), lambda i: (0, 0)),            # bias (resident)
        ],
        out_specs=pl.BlockSpec((bblk, T, H), lambda i: (i, 0, 0)),
        compiler_params=pltpu.CompilerParams(dimension_semantics=("parallel",)),
        cost_estimate=pl.CostEstimate(
            flops=flops, transcendentals=B * T * H, bytes_accessed=bytes_accessed
        ),
    )(cols3, ctx_bf, out_bf, w_mix, w_out, bias)

    return y, attn


# ---------------------------------------------------------------------------
# Main
# ---------------------------------------------------------------------------
if __name__ == "__main__":
    B, T, S, H = 2, 8, 8, 32
    insert_tok = (3, 7)
    vocab = 10

    key = jax.random.PRNGKey(0)
    k_in, k_out, k_ctx, k_w, k_b = jax.random.split(key, 5)

    input_var = jax.random.randint(k_in, (B, T), 0, vocab, dtype=jnp.int32)
    output = jax.random.normal(k_out, (B, T, H), dtype=jnp.float32)
    context = jax.random.normal(k_ctx, (B, S, H), dtype=jnp.float32)

    # Deterministic parameter init for nn.Linear(dim*2, dim): W (H, 2H), b (H,)
    bound = 1.0 / float(jnp.sqrt(2.0 * H))
    w = jax.random.uniform(k_w, (H, 2 * H), jnp.float32, -bound, bound)
    b = jax.random.uniform(k_b, (H,), jnp.float32, -bound, bound)

    y, attn = hard_attention_forward(input_var, output, context, insert_tok, w, b)
    jax.block_until_ready((y, attn))

    # --- check 1: attn matches a literal Python transcription of the PyTorch loops
    iv = jax.device_get(input_var)
    inserted = [0 for _ in range(B)]
    attn_py = [[[0.0] * S for _ in range(T)] for _ in range(B)]
    for bb in range(B):
        for i in range(T):
            if i == 0:
                attn_py[bb][i][0] = 1.0
            elif S >= i - inserted[bb]:
                if int(iv[bb][i]) in insert_tok:
                    inserted[bb] += 1
                attn_py[bb][i][i - inserted[bb] - 1] = 1.0   # negative index wraps like torch
    attn_py = jnp.asarray(attn_py, jnp.float32)
    assert bool(jnp.array_equal(attn, attn_py))

    # --- check 2: f32 reference of the hot path (kernel uses bf16 MXU operands)
    mix_ref = jnp.einsum("bts,bsh->bth", attn, context)
    comb_ref = jnp.concatenate([mix_ref, output], axis=-1)
    y_ref = jnp.tanh(jnp.einsum("btk,hk->bth", comb_ref, w) + b[None, None, :])
    assert jnp.allclose(y, y_ref, atol=2e-2, rtol=2e-2)

    print("KERNEL_OK")
</pallas_src>

<mosaic_0001>
module attributes {stable_mosaic.version = 11 : i64} {
  func.func @_hard_attn_kernel(%arg0: i32, %arg1: memref<1x8x1xi32, #tpu.memory_space<vmem>>, %arg2: memref<1x8x32xbf16, #tpu.memory_space<vmem>>, %arg3: memref<1x8x32xbf16, #tpu.memory_space<vmem>>, %arg4: memref<32x32xbf16, #tpu.memory_space<vmem>>, %arg5: memref<32x32xbf16, #tpu.memory_space<vmem>>, %arg6: memref<1x32xf32, #tpu.memory_space<vmem>>, %arg7: memref<1x8x32xf32, #tpu.memory_space<vmem>>) attributes {dimension_semantics = [#tpu.dimension_semantics<parallel>], iteration_bounds = array<i64: 2>, scalar_prefetch = 0 : i64, scratch_operands = 0 : i64, tpu.core_type = #tpu.core_type<tc>, window_params = [{transform_indices = @transform_0, window_bounds = array<i64: 1, 8, 1>}, {transform_indices = @transform_1, window_bounds = array<i64: 1, 8, 32>}, {transform_indices = @transform_2, window_bounds = array<i64: 1, 8, 32>}, {pipeline_mode = #tpu.pipeline_mode<synchronous>, transform_indices = @transform_3, window_bounds = array<i64: 32, 32>}, {pipeline_mode = #tpu.pipeline_mode<synchronous>, transform_indices = @transform_4, window_bounds = array<i64: 32, 32>}, {pipeline_mode = #tpu.pipeline_mode<synchronous>, transform_indices = @transform_5, window_bounds = array<i64: 1, 32>}, {transform_indices = @transform_6, window_bounds = array<i64: 1, 8, 32>}]} {
    %0 = tpu.iota {dimensions = array<i32: 2>} : vector<1x8x8xi32>
    %c0 = arith.constant 0 : index
    %c0_0 = arith.constant 0 : index
    %c0_1 = arith.constant 0 : index
    %1 = vector.load %arg1[%c0, %c0_0, %c0_1] : memref<1x8x1xi32, #tpu.memory_space<vmem>>, vector<1x8x1xi32>
    %2 = vector.broadcast %1 : vector<1x8x1xi32> to vector<1x8x8xi32>
    %3 = arith.cmpi eq, %0, %2 : vector<1x8x8xi32>
    %4 = arith.extui %3 : vector<1x8x8xi1> to vector<1x8x8xi32>
    %5 = arith.sitofp %4 : vector<1x8x8xi32> to vector<1x8x8xf32>
    %6 = arith.truncf %5 : vector<1x8x8xf32> to vector<1x8x8xbf16>
    %c0_2 = arith.constant 0 : index
    %c0_3 = arith.constant 0 : index
    %c0_4 = arith.constant 0 : index
    %7 = vector.load %arg2[%c0_2, %c0_3, %c0_4] : memref<1x8x32xbf16, #tpu.memory_space<vmem>>, vector<1x8x32xbf16>
    "tpu.trace_start"() <{level = 10 : i32, message = "bts,bsh->bth"}> : () -> ()
    %cst = arith.constant dense<0.000000e+00> : vector<1x8x32xf32>
    %8 = tpu.matmul %6, %7, %cst {dimension_numbers = #tpu.dot_dimension_numbers<[2], [1], [1], [2], [0, 0, 0, 1, 1, 2], [0], [0]>} : vector<1x8x8xbf16>, vector<1x8x32xbf16>, vector<1x8x32xf32> -> vector<1x8x32xf32>
    "tpu.trace_stop"() : () -> ()
    %9 = vector.shape_cast %8 : vector<1x8x32xf32> to vector<8x32xf32>
    %10 = arith.truncf %9 : vector<8x32xf32> to vector<8x32xbf16>
    %c0_5 = arith.constant 0 : index
    %c0_6 = arith.constant 0 : index
    %c0_7 = arith.constant 0 : index
    %11 = vector.load %arg3[%c0_5, %c0_6, %c0_7] : memref<1x8x32xbf16, #tpu.memory_space<vmem>>, vector<1x8x32xbf16>
    %12 = vector.shape_cast %11 : vector<1x8x32xbf16> to vector<8x32xbf16>
    %c0_8 = arith.constant 0 : index
    %c0_9 = arith.constant 0 : index
    %13 = vector.load %arg4[%c0_8, %c0_9] : memref<32x32xbf16, #tpu.memory_space<vmem>>, vector<32x32xbf16>
    %cst_10 = arith.constant dense<0.000000e+00> : vector<8x32xf32>
    %14 = tpu.matmul %10, %13, %cst_10 {dimension_numbers = #tpu.dot_dimension_numbers<[1], [0], [0], [1], [0, 0, 1, 1], [], []>} : vector<8x32xbf16>, vector<32x32xbf16>, vector<8x32xf32> -> vector<8x32xf32>
    %c0_11 = arith.constant 0 : index
    %c0_12 = arith.constant 0 : index
    %15 = vector.load %arg5[%c0_11, %c0_12] : memref<32x32xbf16, #tpu.memory_space<vmem>>, vector<32x32xbf16>
    %cst_13 = arith.constant dense<0.000000e+00> : vector<8x32xf32>
    %16 = tpu.matmul %12, %15, %cst_13 {dimension_numbers = #tpu.dot_dimension_numbers<[1], [0], [0], [1], [0, 0, 1, 1], [], []>} : vector<8x32xbf16>, vector<32x32xbf16>, vector<8x32xf32> -> vector<8x32xf32>
    %17 = arith.addf %14, %16 : vector<8x32xf32>
    %c0_14 = arith.constant 0 : index
    %c0_15 = arith.constant 0 : index
    %18 = vector.load %arg6[%c0_14, %c0_15] : memref<1x32xf32, #tpu.memory_space<vmem>>, vector<1x32xf32>
    %19 = vector.broadcast %18 : vector<1x32xf32> to vector<8x32xf32>
    %20 = arith.addf %17, %19 : vector<8x32xf32>
    %21 = math.tanh %20 : vector<8x32xf32>
    %22 = vector.shape_cast %21 : vector<8x32xf32> to vector<1x8x32xf32>
    %c0_16 = arith.constant 0 : index
    %c0_17 = arith.constant 0 : index
    %c0_18 = arith.constant 0 : index
    %23 = vector.load %arg7[%c0_16, %c0_17, %c0_18] : memref<1x8x32xf32, #tpu.memory_space<vmem>>, vector<1x8x32xf32>
    tpu.vector_store %arg7[%c0_16, %c0_17, %c0_18], %22 {strides = array<i32>} : memref<1x8x32xf32, #tpu.memory_space<vmem>>, vector<1x8x32xf32>,
    return
  }
  func.func @transform_0(%arg0: i32) -> (i32, i32, i32) {
    %c0_i32 = arith.constant 0 : i32
    %c0_i32_0 = arith.constant 0 : i32
    %c0_i32_1 = arith.constant 0 : i32
    return %arg0, %c0_i32, %c0_i32_0 : i32, i32, i32
  }
  func.func @transform_1(%arg0: i32) -> (i32, i32, i32) {
    %c0_i32 = arith.constant 0 : i32
    %c0_i32_0 = arith.constant 0 : i32
    %c0_i32_1 = arith.constant 0 : i32
    return %arg0, %c0_i32, %c0_i32_0 : i32, i32, i32
  }
  func.func @transform_2(%arg0: i32) -> (i32, i32, i32) {
    %c0_i32 = arith.constant 0 : i32
    %c0_i32_0 = arith.constant 0 : i32
    %c0_i32_1 = arith.constant 0 : i32
    return %arg0, %c0_i32, %c0_i32_0 : i32, i32, i32
  }
  func.func @transform_3(%arg0: i32) -> (i32, i32) {
    %c0_i32 = arith.constant 0 : i32
    %c0_i32_0 = arith.constant 0 : i32
    %c0_i32_1 = arith.constant 0 : i32
    return %c0_i32, %c0_i32_0 : i32, i32
  }
  func.func @transform_4(%arg0: i32) -> (i32, i32) {
    %c0_i32 = arith.constant 0 : i32
    %c0_i32_0 = arith.constant 0 : i32
    %c0_i32_1 = arith.constant 0 : i32
    return %c0_i32, %c0_i32_0 : i32, i32
  }
  func.func @transform_5(%arg0: i32) -> (i32, i32) {
    %c0_i32 = arith.constant 0 : i32
    %c0_i32_0 = arith.constant 0 : i32
    %c0_i32_1 = arith.constant 0 : i32
    return %c0_i32, %c0_i32_0 : i32, i32
  }
  func.func @transform_6(%arg0: i32) -> (i32, i32, i32) {
    %c0_i32 = arith.constant 0 : i32
    %c0_i32_0 = arith.constant 0 : i32
    %c0_i32_1 = arith.constant 0 : i32
    return %arg0, %c0_i32, %c0_i32_0 : i32, i32, i32
  }
}

</mosaic_0001>

<bundles_post_ra>
// kernel: tpu_custom_call.1
= control target key start
LH: loop header
LB: loop body
LE: loop exit
PB: predicated region body
PF: predicated region fallthrough
CT: control target
= control target key end

     0   :  { %s1205_s0 = inlined_call_operand.vmem [shape: s32[2,8,1], index: 0, kind: input, shape index: {}]   ;;  %s1206_s1 = inlined_call_operand.hbm [shape: bf16[2,8,32], index: 1, kind: input, shape index: {}]   ;;  %s1207_s2 = inlined_call_operand.hbm [shape: bf16[2,8,32], index: 2, kind: input, shape index: {}]   ;;  %s1208_s3 = inlined_call_operand.vmem [shape: bf16[32,32], index: 3, kind: input, shape index: {}]   ;;  %s1209_s4 = inlined_call_operand.hbm [shape: bf16[32,32], index: 4, kind: input, shape index: {}]   ;;  %s1210_s5 = inlined_call_operand.vmem [shape: f32[1,32], index: 5, kind: input, shape index: {}]   ;;  %s1211_s6 = inlined_call_operand.hbm [shape: f32[2,8,32], index: 6, kind: output, shape index: {}]  }
   0x1   :  { %1217 = sst [smem:[#allocation15_spill]] %s1209_s4 }
   0x2   :  { %11 = vsyncpa [#allocation3], 0 }
   0x3   :  { %13 = vsyncpa [#allocation3 + $0x1], 0 }
   0x4   :  { %14 = vsyncpa [#allocation6], 0 }
   0x5   :  { %16 = vsyncpa [#allocation6 + $0x1], 0 }
   0x6   :  { %17 = vsyncpa [#allocation4], 0 }
   0x7   :  { %19 = vsyncpa [#allocation4 + $0x1], 0  ;;  %s985_s21 = smov 0   ;;  %s987_s22 = smov 0  }
   0x8   :  { %s989_s23 = smov 0   ;;  %s991_s24 = smov 0  }
   0x9 LB: > { %1218 = sst [smem:[#allocation13_spill]] %s935_s23  ;;  %s1006_s25 = sadd.s32 4294967295, %s939_s24   ;;  %s939_s24 = sphi %s991_s24, %s1239_s24   ;;  %s935_s23 = sphi %s989_s23, %s1236_s23   ;;  %s931_s22 = sphi %s987_s22, %s1238_s22   ;;  %s927_s21 = sphi %s985_s21, %s1237_s21  }
   0xa   : > { %s654_s26 = sadd.s32 4294967294, %s939_s24   ;;  %p71_p0 = scmp.ne.s32.totalorder %s931_s22, %s927_s21 }
   0xb   : > { %p1213_p1 = scmp.eq.s32.totalorder %s1006_s25, 0  ;;  %p190_p3 = scmp.eq.s32.totalorder %s654_s26, 1 }
   0xc   : > { %p655_p5 = scmp.ge.s32.totalorder %s939_s24, 1  ;;  %p197_p7 = scmp.lt.s32.totalorder %s939_s24, 3 }
   0xd   : > { %p1015_p4 = por %p1213_p1, %p71_p0  ;;  %p1020_p6 = por %p190_p3, %p71_p0 }
   0xe   : > { %p1025_p8 = pnand %p655_p5, %p197_p7  ;;  %s941_s30 = smov [#allocation7]  }
   0xf   : > { %s1219_s27 = scalar_select %p1015_p4, 1, 0 }
  0x10   : > { %s1220_s28 = scalar_select %p1020_p6, 1, 0 }
  0x11   : > { %s1221_s29 = scalar_select %p1025_p8, 1, 0 }
  0x12   : > { %s212_s7 = sshll.u32 %s941_s30, 4  ;;  %p721_p9 = pneg %p1025_p8  ;;  %s213_s7 = int_to_ptr.vmem [resolvable:$true] %s212_s7 }
  0x13   : > { %s1039_s9 = sadd.s32 1, %s939_s24   ;;  %s58_s10 = sadd.s32 1, %s935_s23 }
  0x14   : > { %p1034_p11 = pnand %p721_p9, %p1213_p1  ;;  %s55_s11 = ssub.s32 %s939_s24, %s1039_s9 }
  0x15   : > { %s796_s12 = scalar_lea.vmem %s213_s7, 256  ;;  %p804_p5 = scmp.lt.s32.totalorder %s213_s7, %s213_s7 }
  0x16   : > { %p787_p12 = pneg %p1034_p11  ;;  %p797_p13 = scmp.ne.s32.totalorder %s213_s7, %s796_s12 }
  0x17   : > { %p805_p7 = scmp.lt.s32.totalorder %s796_s12, %s796_s12 }
  0x18   : > { %p799_p0 = pnand %p797_p13, %p787_p12 }
  0x19   : > { %p806_p10 = por %p805_p7, %p804_p5 }
  0x1a   : > { %p800_p3 = pneg %p799_p0 }
  0x1c   : > { %p807_p2 = pnand %p806_p10, %p800_p3 }
  0x1e   : > { %810 = shalt.err (!%p807_p2)
}
  0x1f   : > { %s942_s13 = smov 64   ;;  %s943_s14 = smov 4  }
  0x20   : > { %s1223_s4 = sld [smem:[#allocation15_spill]]  ;;  %p56_p9 = scmp.eq.s32.totalorder %s55_s11, 0 }
  0x21   : > { %p65_p12 = scmp.ne.s32.totalorder %s935_s23, %s931_s22  ;;  %p66_p10 = scmp.eq.s32.totalorder %s939_s24, 0 }
  0x22   : > { %p737_p2 = scmp.lt.s32.totalorder %s939_s24, 2  ;;  %p1225_p0 = scmp.eq.s32.totalorder %s1006_s25, 1 }
  0x23   : > { %s1056_s17 = scalar_select %p56_p9, %s935_s23, %s58_s10  }
  0x24   : > { %p67_p13 = por %p66_p10, %p65_p12  ;;  %p1060_p3 = por %p1225_p0, %p65_p12 }
  0x25   : > { %1224 = sst [smem:[#allocation14_spill]] %s1056_s17  ;;  %s236_s19 = sand.u32 1, %s935_s23  }
  0x26   : > { %724 = dma.hbm_to_vmem [thread:$0]  (!%p1034_p11), %s1223_s4, 256, %s213_s7, [#allocation6], %s942_s13, %s942_s13, %s943_s14  }
  0x27   : > { %s1226_s18 = scalar_select %p1060_p3, 1, 0 }
  0x28   : > { %s659_s20 = sshll.u32 %s939_s24, 6  ;;  %s1066_s26 = sshll.u32 %s236_s19, 2 }
  0x29   : > { %s1071_s7 = scalar_lea.hbm %s1206_s1, %s659_s20  ;;  %s240_s10 = scalar_lea.vmem [#allocation2], %s1066_s26 }
  0x2a   : > { %s247_s11 = sshll.u32 %s240_s10, 4  ;;  %p1074_p11 = pnand %p737_p2, %p67_p13  ;;  %s248_s11 = int_to_ptr.vmem [resolvable:$true] %s247_s11 }
  0x2b   : > { %s1081_s15 = scalar_lea.hbm %s1207_s2, %s659_s20  ;;  %s237_s16 = scalar_lea.sflag [#allocation3], %s236_s19 }
  0x2c   : > { %s811_s30 = scalar_lea.hbm %s1071_s7, 64  ;;  %p813_p7 = pneg %p1074_p11 }
  0x2d   : > { %p812_p5 = scmp.ne.s32.totalorder %s1071_s7, %s811_s30  ;;  %s816_s4 = scalar_lea.hbm %s1206_s1, 128 }
  0x2e   : > { %p817_p10 = scmp.lt.s32.totalorder %s1071_s7, %s1206_s1  ;;  %p818_p2 = scmp.lt.s32.totalorder %s816_s4, %s811_s30 }
  0x2f   : > { %p814_p9 = pnand %p813_p7, %p812_p5 }
  0x30   : > { %p819_p13 = por %p818_p2, %p817_p10 }
  0x31   : > { %p815_p12 = pneg %p814_p9 }
  0x33   : > { %p820_p0 = pnand %p819_p13, %p815_p12 }
  0x35   : > { %823 = shalt.err (!%p820_p0)
}
  0x36   : > { %s824_s19 = scalar_lea.vmem %s248_s11, 64  ;;  %s944_s20 = smov [#allocation2]  }
  0x37   : > { %p825_p1 = scmp.ne.s32.totalorder %s248_s11, %s824_s19  ;;  %s829_s13 = sshll.u32 %s944_s20, 4  ;;  %s830_s13 = int_to_ptr.vmem [resolvable:$false] %s829_s13 }
  0x38   : > { %s831_s14 = scalar_lea.vmem %s830_s13, 128  ;;  %p832_p9 = scmp.lt.s32.totalorder %s248_s11, %s830_s13 }
  0x39   : > { %p827_p6 = pnand %p825_p1, %p813_p7  ;;  %p833_p3 = scmp.lt.s32.totalorder %s831_s14, %s824_s19 }
  0x3b   : > { %p828_p5 = pneg %p827_p6  ;;  %p834_p4 = por %p833_p3, %p832_p9 }
  0x3d   : > { %p835_p8 = pnand %p834_p4, %p828_p5 }
  0x3f   : > { %838 = shalt.err (!%p835_p8)
}
  0x40   : > { %728 = dma.hbm_to_vmem [thread:$0]  (!%p1074_p11), %s1071_s7, 64, %s248_s11, %s237_s16  }
  0x41   : > { %s254_s4 = sand.u32 1, %s939_s24   ;;  %s258_s23 = scalar_lea.vmem [#allocation5], %s1066_s26 }
  0x42   : > { %s265_s17 = sshll.u32 %s258_s23, 4  ;;  %s255_s30 = scalar_lea.sflag [#allocation6], %s254_s4  ;;  %s266_s17 = int_to_ptr.vmem [resolvable:$true] %s265_s17 }
  0x43   : > { %s839_s8 = scalar_lea.hbm %s1081_s15, 64  ;;  %s844_s20 = scalar_lea.hbm %s1207_s2, 128 }
  0x44   : > { %p840_p1 = scmp.ne.s32.totalorder %s1081_s15, %s839_s8  ;;  %p845_p8 = scmp.lt.s32.totalorder %s1081_s15, %s1207_s2 }
  0x45   : > { %p846_p3 = scmp.lt.s32.totalorder %s844_s20, %s839_s8 }
  0x46   : > { %p842_p4 = pnand %p840_p1, %p813_p7 }
  0x47   : > { %p847_p12 = por %p846_p3, %p845_p8 }
  0x48   : > { %p843_p6 = pneg %p842_p4 }
  0x4a   : > { %p848_p10 = pnand %p847_p12, %p843_p6 }
  0x4c   : > { %851 = shalt.err (!%p848_p10)
}
  0x4d   : > { %s852_s26 = scalar_lea.vmem %s266_s17, 64  ;;  %s945_s7 = smov [#allocation5]  }
  0x4e   : > { %p853_p2 = scmp.ne.s32.totalorder %s266_s17, %s852_s26  ;;  %s857_s11 = sshll.u32 %s945_s7, 4  ;;  %s858_s11 = int_to_ptr.vmem [resolvable:$false] %s857_s11 }
  0x4f   : > { %s859_s16 = scalar_lea.vmem %s858_s11, 128  ;;  %p860_p5 = scmp.lt.s32.totalorder %s266_s17, %s858_s11 }
  0x50   : > { %p855_p13 = pnand %p853_p2, %p813_p7  ;;  %p861_p9 = scmp.lt.s32.totalorder %s859_s16, %s852_s26 }
  0x52   : > { %p856_p0 = pneg %p855_p13  ;;  %p862_p1 = por %p861_p9, %p860_p5 }
  0x54   : > { %p863_p4 = pnand %p862_p1, %p856_p0 }
  0x56   : > { %866 = shalt.err (!%p863_p4)
}
  0x57   : > { %731 = dma.hbm_to_vmem [thread:$0]  (!%p1074_p11), %s1081_s15, 64, %s266_s17, %s255_s30  }
  0x58   : > { %p1228_p6 = scmp.ne.s32.totalorder %s1221_s29, 0 }
  0x59   : > { %s1126_s4 = sand.u32 (!%p1228_p6), 1, %s931_s22   ;;  %p1229_p7 = scmp.ne.s32.totalorder (!%p1228_p6), %s1219_s27, 0 }
  0x5a   : > { %274 = sbr.rel (%p1228_p6) target bundleno = 656 (0x290), region = 44  ;;  %s663_s23 = sshll.u32 (!%p1228_p6), %s1126_s4, 2 }
  0x5b   : > { %s277_s8 = scalar_lea.sflag (!%p1228_p6), [#allocation3], %s1126_s4  ;;  %s280_s10 = scalar_lea.vmem (!%p1228_p6), [#allocation2], %s663_s23 }
  0x5f   : > { %910 = dma.done.wait (%p1229_p7), %s277_s8, 64  }
  0x60   : > { %912 = vsyncadd (%p1229_p7), %s277_s8, 4294967232  ;;  %s285_s12 = sand.u32 1, %s1006_s25   ;;  %s289_s29 = scalar_lea.vmem [#allocation5], %s663_s23 }
  0x61   : > { %s286_s15 = scalar_lea.sflag [#allocation6], %s285_s12 }
  0x62   : > { %914 = dma.done.wait (%p1229_p7), %s286_s15, 64  }
  0x63   : > { %916 = vsyncadd (%p1229_p7), %s286_s15, 4294967232  ;;  %p1230_p11 = scmp.eq.s32.totalorder %s1006_s25, 0 }
  0x65   : > { %918 = dma.done.wait (%p1230_p11), [#allocation6], 256   ;;  %p1231_p8 = pmov %p1230_p11 }
  0x66   : > { %p331_p3 = scmp.lt.s32.totalorder %s1006_s25, 1  ;;  %v946_v0 = vmov 0   ;;  %v947_v1 = vmov 0.0   ;;  %vm351_vm0 = vcmask 1043456   ;;  %v346_v3 = vld [vmem:[%s280_s10] sm:$0xf]  ;;  %v336_v8 = vlaneseq }
  0x67   : > { %920 = vsyncadd (%p1231_p8), [#allocation6], 4294967040  ;;  %778 = vset.pattern.permute.xlu0 %v946_v0  ;;  %689 = vmatprep.subr.bf16.mxu0 %v947_v1  ;;  %vm948_vm1 = vmmov 0   ;;  %v353_v4 = vsel %vm351_vm0, %v346_v3, 0  ;;  %v779_v5 = vld [vmem:[#allocation7 + $0x8] sm:$0xff]   ;;  %v780_v6 = vld [vmem:[#allocation7] sm:$0xff]  }
  0x68   : > { %s332_s17 = scalar_select %p331_p3, %s1006_s25, 1  ;;  %695 = vmatprep.subr.bf16.mxu1 %v947_v1  ;;  %691 = vmatprep.mubr.msk.bf16.mxu0 %vm948_vm1, %v947_v1  ;;  %v396_v7 = vld [vmem:[%s289_s29] sm:$0xf]  ;;  %vm417_vm2 = vcmask 261120   ;;  %v337_v9 = vand.u32 127, %v336_v8  ;;  %vm347_vm4 = vcmask 64512  }
  0x69   : > { %699 = vmatprep.mubr.msk.bf16.mxu1 %vm948_vm1, %v947_v1  ;;  %690 = vmatpush3.bf16.msra.mxu0 %v353_v4  ;;  %v781_v12 = vld [vmem:[%s1208_s3 + $0x8] sm:$0xff]   ;;  %v782_v14 = vld [vmem:[%s1208_s3] sm:$0xff]   ;;  %s666_s23 = sshll.u32 %s1126_s4, 3  ;;  %s678_s8 = sshll.u32 %s1006_s25, 7 }
  0x6a   : > { %s667_s30 = sshll.u32 %s332_s17, 3  ;;  %696 = vmatpush3.bf16.msra.mxu1 %v779_v5  ;;  %703 = vmatprep.subr.bf16.mxu0 %v947_v1  ;;  %v676_v25 = vld [vmem:[%s1210_s5] ss:$0 sm:$0xff]  ;;  %s330_s10 = scalar_lea.vmem [#allocation8], %s666_s23 }
  0x6b   : > { %s334_s27 = scalar_lea.vmem %s1205_s0, %s667_s30  ;;  %697 = vmatprep.subr.bf16.mxu1 %v947_v1  ;;  %s540_s12 = sshll.u32 %s330_s10, 4  ;;  %s541_s12 = int_to_ptr.vmem [resolvable:$true] %s540_s12 }
  0x6c   : > { %v338_v2 = vld [vmem:[%s334_s27] sm:$0xff]  ;;  %s1167_s17 = scalar_lea.hbm %s1211_s6, %s678_s8  ;;  %s527_s30 = scalar_lea.sflag [#allocation4], %s1126_s4 }
  0x6d   : > { %340 = vperm.xlu0 %778, %v338_v2   ;;  %s867_s19 = scalar_lea.vmem %s541_s12, 128  ;;  %p1232_p10 = scmp.ne.s32.totalorder %s1226_s18, 0 }
  0x6e   : > { %698 = vmatpush3.bf16.msra.mxu1 %v780_v6  ;;  %p868_p12 = scmp.ne.s32.totalorder %s541_s12, %s867_s19  ;;  %s949_s20 = smov [#allocation8]  }
  0x6f   : > { %s871_s27 = sshll.u32 %s949_s20, 4  ;;  %s872_s27 = int_to_ptr.vmem [resolvable:$false] %s871_s27 }
  0x70   : > { %p869_p2 = pnand %p868_p12, %p1232_p10  ;;  %s873_s25 = scalar_lea.vmem %s872_s27, 256 }
  0x71   : > { %700 = vmatmul.mubr.msk.bf16.vlgmr.msra.gmra.mxu1 %vm417_vm2, %v396_v7  ;;  %p874_p0 = scmp.lt.s32.totalorder %s541_s12, %s872_s27  ;;  %p875_p5 = scmp.lt.s32.totalorder %s873_s25, %s867_s19 }
  0x72   : > { %p870_p13 = pneg %p869_p2 }
  0x73   : > { %p876_p9 = por %p875_p5, %p874_p0 }
  0x75   : > { %p877_p1 = pnand %p876_p9, %p870_p13 }
  0xe8   : > { %v341_v10 = vpop.permute.xlu0 %340 }
  0xe9   : > { %vm342_vm3 = vcmp.eq.s32.totalorder %v337_v9, %v341_v10 }
  0xea   : > { %v668_v11 = vsel %vm342_vm3, 1.0, %v947_v1 }
  0xeb   : > { %v345_v13 = vpack.c.bf16 %v668_v11, %v668_v11 }
  0xed   : > { %692 = vmatmul.mubr.msk.bf16.vlgmr.msra.gmra.mxu0 %vm347_vm4, %v345_v13 }
  0xee   : > { %704 = vmatpush3.bf16.msra.mxu0 %v781_v12  ;;  %707 = vmatprep.mubr.msk.bf16.mxu0 %vm948_vm1, %v947_v1 }
  0xef   : > { %705 = vmatprep.subr.bf16.mxu0 %v947_v1 }
  0xf2   : > { %706 = vmatpush3.bf16.msra.mxu0 %v782_v14 }
 0x131   : > { %v455_v15 = vpop.f32.mrf.mxu1 }
 0x133   : > { %v701_v16 = vpop.f32.mrf.mxu1 }
 0x135   : > { %v458_v17 = vpop.f32.mrf.mxu1 }
 0x137   : > { %v702_v18 = vpop.f32.mrf.mxu1 }
 0x1ad   : > { %v389_v19 = vpop.f32.mrf.mxu0 }
 0x1ae   : > { %v395_v20 = vpack.c.bf16 %v389_v19, %v389_v19 }
 0x1af   : > { %v693_v21 = vpop.f32.mrf.mxu0 }
 0x1b0   : > { %708 = vmatmul.mubr.msk.bf16.vlgmr.msra.gmra.mxu0 %vm417_vm2, %v395_v20 }
 0x1b1   : > { %v392_v22 = vpop.f32.mrf.mxu0 }
 0x1b3   : > { %v694_v23 = vpop.f32.mrf.mxu0 }
 0x270   : > { %v510_v24 = vpop.f32.mrf.mxu0 }
 0x271   : > { %v511_v26 = vadd.f32 %v510_v24, %v455_v15 }
 0x272   : > { %v709_v27 = vpop.f32.mrf.mxu0 }
 0x273   : > { %v523_v28 = vadd.f32 %v676_v25, %v511_v26 }
 0x274   : > { %v513_v29 = vpop.f32.mrf.mxu0 }
 0x275   : > { %783 = vtanh.f32 %v523_v28 }
 0x276   : > { %v710_v30 = vpop.f32.mrf.mxu0 }
 0x282   : > { %v784_v31 = vpop.eup %783 }
 0x283   : > { %525 = vst.msk [vmem:[%s330_s10] sm:$0xff] %vm417_vm2, %v784_v31 }
 0x284   : > { %880 = shalt.err (!%p877_p1)
}
 0x285   : > { %s881_s13 = scalar_lea.hbm %s1167_s17, 128  ;;  %s885_s26 = scalar_lea.hbm %s1211_s6, 256 }
 0x286   : > { %p882_p4 = scmp.ne.s32.totalorder %s1167_s17, %s881_s13  ;;  %p886_p11 = scmp.lt.s32.totalorder %s1167_s17, %s1211_s6 }
 0x287   : > { %p887_p8 = scmp.lt.s32.totalorder %s885_s26, %s881_s13 }
 0x288   : > { %p883_p6 = pnand %p882_p4, %p1232_p10 }
 0x289   : > { %p888_p3 = por %p887_p8, %p886_p11 }
 0x28a   : > { %p884_p7 = pneg %p883_p6 }
 0x28c   : > { %p889_p12 = pnand %p888_p3, %p884_p7 }
 0x28e   : > { %892 = shalt.err (!%p889_p12)
}
 0x28f   : > { %719 = dma.vmem_to_hbm [thread:$0]  (%p1232_p10), %s541_s12, 128, %s1167_s17, %s527_s30  }
 0x290 PF: > { %s552_s16 = sand.u32 1, %s927_s21   ;;  %p1233_p2 = scmp.ne.s32.totalorder %s1220_s28, 0 }
 0x291   : > { %p1234_p13 = scmp.ge.s32.totalorder %s939_s24, 2  ;;  %s553_s23 = scalar_lea.sflag [#allocation4], %s552_s16 }
 0x293   : > { %p733_p0 = pnand %p1234_p13, %p1233_p2 }
 0x295   : > { %p734_p5 = pneg %p733_p0 }
 0x297   : > { %922 = dma.done.wait (%p734_p5), %s553_s23, 128  }
 0x298   : > { %924 = vsyncadd (%p734_p5), %s553_s23, 4294967168  ;;  %s1235_s8 = sld [smem:[#allocation13_spill]]  ;;  %p22_p9 = scmp.ge.s32.totalorder %s1039_s9, 4  }
 0x299   : > { %s1236_s23 = sld [smem:[#allocation14_spill]]  ;;  %s1237_s21 = smov %s931_s22 }
 0x29a   : > { %s1239_s24 = smov %s1039_s9  ;;  %24 = sbr.rel (!%p22_p9) target bundleno = 9 (0x9), region = 109 }
 0x29e   : > { %s1238_s22 = smov %s1235_s8 }
 0x29f   :  { %558 = vsyncpa [#allocation3], 1 }
 0x2a0   :  { %560 = vsyncpa [#allocation3 + $0x1], 1 }
 0x2a1   :  { %561 = vsyncpa [#allocation6], 1 }
 0x2a2   :  { %563 = vsyncpa [#allocation6 + $0x1], 1 }
 0x2a3   :  { %564 = vsyncpa [#allocation4], 1 }
 0x2a4   :  { %566 = vsyncpa [#allocation4 + $0x1], 1 }

</bundles_post_ra>
